<compile_context>
chip_gen: v5e
topology: v5e:2x2
jax: 0.10.0
libtpu: 0.0.40
codegen_flags: <defaults>
</compile_context>

<pallas_src>
import functools

import jax
import jax.numpy as jnp
from jax.experimental import pallas as pl
from jax.experimental.pallas import tpu as pltpu


def _residual_block_kernel(x_ref, m_ref, w1_ref, b1_ref, w2_ref, b2_ref,
                           o_ref, *, W, L):
    """One grid step = one batch tile, lane-packed as (Cp, L = nb*H*W)."""
    x = x_ref[0]                 # (Cp, L) residual / conv1 input, lane-dense
    mask = m_ref[...]            # (9*Cp, L): 0 where a tap reads outside image
    w1 = w1_ref[...]             # (Cp, 9*Cp), BN1 scale folded; [co, k*Cp+ci]
    w2 = w2_ref[...]             # (Cp, 9*Cp), BN2 scale folded
    b1 = b1_ref[...]             # (Cp, 1) folded BN1 bias
    b2 = b2_ref[...]             # (Cp, 1) folded BN2 bias

    def conv3x3_bn(v, w, b):
        # shifted_k[:, q] == v[:, q + dy*W + dx]; taps that would read outside
        # their source image (including wrap-around across the images packed
        # on the lane axis) are zeroed by `mask` after stacking.  The shifts
        # ride the XLU rotate slot; the contraction rides the MXU.
        taps = []
        for k in range(9):
            d = (k // 3 - 1) * W + (k % 3 - 1)        # flat spatial shift
            taps.append(v if d == 0 else pltpu.roll(v, (-d) % L, axis=1))
        s = jnp.concatenate(taps, axis=0) * mask      # (9*Cp, L), 8-row aligned
        # One MXU contraction per convolution, f32 accumulation.
        return jnp.dot(w, s, preferred_element_type=jnp.float32) + b

    h = jnp.maximum(conv3x3_bn(x, w1, b1), 0.0)       # conv1 -> BN1 -> ReLU
    y = conv3x3_bn(h, w2, b2) + x                     # conv2 -> BN2 -> +residual
    o_ref[0] = jnp.maximum(y, 0.0)                    # final ReLU


def _make_tap_masks(H, W):
    """(9, H*W) f32 masks: 1.0 where tap (dy, dx) reads inside the image."""
    y = jnp.arange(H)[:, None]
    x = jnp.arange(W)[None, :]
    rows = []
    for k in range(9):
        dy, dx = k // 3 - 1, k % 3 - 1
        valid = (y + dy >= 0) & (y + dy < H) & (x + dx >= 0) & (x + dx < W)
        rows.append(valid.reshape(-1))
    return jnp.stack(rows).astype(jnp.float32)


def _residual_block_pallas(x_tiles, mask, w1, b1, w2, b2, *, W):
    """x_tiles: (G, Cp, L); mask: (9*Cp, L); w*: (Cp, 9*Cp); b*: (Cp, 1)."""
    G, Cp, L = x_tiles.shape
    kernel = functools.partial(_residual_block_kernel, W=W, L=L)

    grid_spec = pltpu.PrefetchScalarGridSpec(
        num_scalar_prefetch=0,
        grid=(G,),                                         # 1 step by default
        in_specs=[
            pl.BlockSpec((1, Cp, L), lambda g: (g, 0, 0)),  # activations
            pl.BlockSpec((9 * Cp, L), lambda g: (0, 0)),    # stacked tap masks
            pl.BlockSpec((Cp, 9 * Cp), lambda g: (0, 0)),   # w1 (scale folded)
            pl.BlockSpec((Cp, 1), lambda g: (0, 0)),        # bias1
            pl.BlockSpec((Cp, 9 * Cp), lambda g: (0, 0)),   # w2 (scale folded)
            pl.BlockSpec((Cp, 1), lambda g: (0, 0)),        # bias2
        ],
        out_specs=pl.BlockSpec((1, Cp, L), lambda g: (g, 0, 0)),
    )
    return pl.pallas_call(
        kernel,
        out_shape=jax.ShapeDtypeStruct((G, Cp, L), jnp.float32),
        grid_spec=grid_spec,
        compiler_params=pltpu.CompilerParams(dimension_semantics=("parallel",)),
    )(x_tiles, mask, w1, b1, w2, b2)


def residual_block_nchw(x_nchw, params, *, batch_tile=None):
    """PyTorch-facing wrapper: x in NCHW, conv weights in (Cout, Cin, 3, 3).

    batch_tile=None collapses the whole batch into a single grid step
    (best at small N); set batch_tile < N to keep a parallel grid axis
    (e.g. for v7x megacore at larger batch sizes).
    """
    (w1_t, g1, be1, m1, v1, w2_t, g2, be2, m2, v2) = params
    eps = 1e-5
    N, C, H, W = x_nchw.shape
    P = H * W
    nb = N if batch_tile is None else batch_tile
    assert N % nb == 0, "batch_tile must divide the batch size"
    G = N // nb
    L = nb * P
    Cp = ((C + 7) // 8) * 8          # pad channels to full sublane tiles

    # Fold BatchNorm (inference) into per-channel scale/bias, then fold the
    # scale straight into the conv weights (only bias stays in the kernel).
    s1 = g1 / jnp.sqrt(v1 + eps)
    s2 = g2 / jnp.sqrt(v2 + eps)
    b1 = be1 - m1 * s1
    b2 = be2 - m2 * s2

    def pack_weights(w_oihw, scale):
        # (Cout, Cin, 3, 3) -> (Cout, k, Cin) with k = kh*3+kw, BN scale folded
        # into output rows, zero-padded to (Cp, 9*Cp), column index k*Cp + ci.
        w_okc = jnp.transpose(w_oihw, (0, 2, 3, 1)).reshape(C, 9, C)
        w_okc = w_okc.astype(jnp.float32) * scale[:, None, None]
        return (jnp.zeros((Cp, 9, Cp), jnp.float32)
                .at[:C, :, :C].set(w_okc)
                .reshape(Cp, 9 * Cp))

    w1 = pack_weights(w1_t, s1)
    w2 = pack_weights(w2_t, s2)
    b1p = jnp.zeros((Cp, 1), jnp.float32).at[:C, 0].set(b1)
    b2p = jnp.zeros((Cp, 1), jnp.float32).at[:C, 0].set(b2)

    # NCHW -> (G, Cp, nb*H*W): the nb images of a batch tile are concatenated
    # on the lane axis; channels (zero-padded to Cp) live on sublanes.
    x_tiles = (x_nchw.astype(jnp.float32)
               .reshape(G, nb, C, P)
               .transpose(0, 2, 1, 3)
               .reshape(G, C, L))
    x_tiles = jnp.pad(x_tiles, ((0, 0), (0, Cp - C), (0, 0)))

    # (9, P) in-image tap masks -> tiled across the nb images of a tile and
    # repeated per input channel: row k*Cp + ci of the stacked S uses mask k.
    mask = jnp.repeat(jnp.tile(_make_tap_masks(H, W), (1, nb)), Cp, axis=0)

    y_tiles = _residual_block_pallas(x_tiles, mask, w1, b1p, w2, b2p, W=W)
    return (y_tiles[:, :C, :]
            .reshape(G, C, nb, P)
            .transpose(0, 2, 1, 3)
            .reshape(N, C, H, W))


def _reference_nchw(x, params):
    """Pure-JAX reference (NCHW, lax conv) for verification."""
    (w1, g1, be1, m1, v1, w2, g2, be2, m2, v2) = params
    eps = 1e-5

    def conv(x, w):
        return jax.lax.conv_general_dilated(
            x, w, window_strides=(1, 1), padding=((1, 1), (1, 1)),
            dimension_numbers=("NCHW", "OIHW", "NCHW"))

    def bn(x, g, b, m, v):
        g = g.reshape(1, -1, 1, 1); b = b.reshape(1, -1, 1, 1)
        m = m.reshape(1, -1, 1, 1); v = v.reshape(1, -1, 1, 1)
        return (x - m) / jnp.sqrt(v + eps) * g + b

    out = jax.nn.relu(bn(conv(x, w1), g1, be1, m1, v1))
    out = bn(conv(out, w2), g2, be2, m2, v2)
    return jax.nn.relu(out + x)


if __name__ == "__main__":
    N, C, H, W = 2, 4, 16, 16
    key = jax.random.PRNGKey(0)
    keys = jax.random.split(key, 11)

    x = jax.random.normal(keys[0], (N, C, H, W), jnp.float32)
    w1 = jax.random.normal(keys[1], (C, C, 3, 3), jnp.float32) * 0.1
    w2 = jax.random.normal(keys[2], (C, C, 3, 3), jnp.float32) * 0.1
    g1 = jax.random.uniform(keys[3], (C,), jnp.float32, 0.5, 1.5)
    be1 = jax.random.normal(keys[4], (C,), jnp.float32) * 0.1
    m1 = jax.random.normal(keys[5], (C,), jnp.float32) * 0.1
    v1 = jax.random.uniform(keys[6], (C,), jnp.float32, 0.5, 1.5)
    g2 = jax.random.uniform(keys[7], (C,), jnp.float32, 0.5, 1.5)
    be2 = jax.random.normal(keys[8], (C,), jnp.float32) * 0.1
    m2 = jax.random.normal(keys[9], (C,), jnp.float32) * 0.1
    v2 = jax.random.uniform(keys[10], (C,), jnp.float32, 0.5, 1.5)

    params = (w1, g1, be1, m1, v1, w2, g2, be2, m2, v2)

    y = residual_block_nchw(x, params)
    y = jax.block_until_ready(y)

    y_ref = _reference_nchw(x, params)
    assert y.shape == (N, C, H, W)
    # f32 operands with f32 MXU accumulation; tolerance leaves headroom for
    # TPU conv/dot summation-order differences vs the lax reference.
    assert jnp.allclose(y, y_ref, atol=1e-3, rtol=1e-3), "mismatch vs reference"

    print("KERNEL_OK")
</pallas_src>

<mosaic_0001>
module attributes {stable_mosaic.version = 11 : i64} {
  func.func @_residual_block_kernel(%arg0: i32, %arg1: memref<1x8x512xf32, #tpu.memory_space<vmem>>, %arg2: memref<72x512xf32, #tpu.memory_space<vmem>>, %arg3: memref<8x72xf32, #tpu.memory_space<vmem>>, %arg4: memref<8x1xf32, #tpu.memory_space<vmem>>, %arg5: memref<8x72xf32, #tpu.memory_space<vmem>>, %arg6: memref<8x1xf32, #tpu.memory_space<vmem>>, %arg7: memref<1x8x512xf32, #tpu.memory_space<vmem>>) attributes {dimension_semantics = [#tpu.dimension_semantics<parallel>], iteration_bounds = array<i64: 1>, scalar_prefetch = 0 : i64, scratch_operands = 0 : i64, tpu.core_type = #tpu.core_type<tc>, window_params = [{transform_indices = @transform_0, window_bounds = array<i64: 1, 8, 512>}, {pipeline_mode = #tpu.pipeline_mode<synchronous>, transform_indices = @transform_1, window_bounds = array<i64: 72, 512>}, {pipeline_mode = #tpu.pipeline_mode<synchronous>, transform_indices = @transform_2, window_bounds = array<i64: 8, 72>}, {pipeline_mode = #tpu.pipeline_mode<synchronous>, transform_indices = @transform_3, window_bounds = array<i64: 8, 1>}, {pipeline_mode = #tpu.pipeline_mode<synchronous>, transform_indices = @transform_4, window_bounds = array<i64: 8, 72>}, {pipeline_mode = #tpu.pipeline_mode<synchronous>, transform_indices = @transform_5, window_bounds = array<i64: 8, 1>}, {transform_indices = @transform_6, window_bounds = array<i64: 1, 8, 512>}]} {
    %c0 = arith.constant 0 : index
    %c0_0 = arith.constant 0 : index
    %c0_1 = arith.constant 0 : index
    %0 = vector.load %arg1[%c0, %c0_0, %c0_1] : memref<1x8x512xf32, #tpu.memory_space<vmem>>, vector<1x8x512xf32>
    %1 = vector.shape_cast %0 : vector<1x8x512xf32> to vector<8x512xf32>
    %c0_2 = arith.constant 0 : index
    %c0_3 = arith.constant 0 : index
    %2 = vector.load %arg2[%c0_2, %c0_3] : memref<72x512xf32, #tpu.memory_space<vmem>>, vector<72x512xf32>
    %c0_4 = arith.constant 0 : index
    %c0_5 = arith.constant 0 : index
    %3 = vector.load %arg3[%c0_4, %c0_5] : memref<8x72xf32, #tpu.memory_space<vmem>>, vector<8x72xf32>
    %c0_6 = arith.constant 0 : index
    %c0_7 = arith.constant 0 : index
    %4 = vector.load %arg5[%c0_6, %c0_7] : memref<8x72xf32, #tpu.memory_space<vmem>>, vector<8x72xf32>
    %c0_8 = arith.constant 0 : index
    %c0_9 = arith.constant 0 : index
    %5 = vector.load %arg4[%c0_8, %c0_9] : memref<8x1xf32, #tpu.memory_space<vmem>>, vector<8x1xf32>
    %c0_10 = arith.constant 0 : index
    %c0_11 = arith.constant 0 : index
    %6 = vector.load %arg6[%c0_10, %c0_11] : memref<8x1xf32, #tpu.memory_space<vmem>>, vector<8x1xf32>
    %c17_i32 = arith.constant 17 : i32
    %7 = tpu.dynamic_rotate %1 by %c17_i32 dim 1 : vector<8x512xf32>, i32 -> vector<8x512xf32>
    %c16_i32 = arith.constant 16 : i32
    %8 = tpu.dynamic_rotate %1 by %c16_i32 dim 1 : vector<8x512xf32>, i32 -> vector<8x512xf32>
    %c15_i32 = arith.constant 15 : i32
    %9 = tpu.dynamic_rotate %1 by %c15_i32 dim 1 : vector<8x512xf32>, i32 -> vector<8x512xf32>
    %c1_i32 = arith.constant 1 : i32
    %10 = tpu.dynamic_rotate %1 by %c1_i32 dim 1 : vector<8x512xf32>, i32 -> vector<8x512xf32>
    %c511_i32 = arith.constant 511 : i32
    %11 = tpu.dynamic_rotate %1 by %c511_i32 dim 1 : vector<8x512xf32>, i32 -> vector<8x512xf32>
    %c497_i32 = arith.constant 497 : i32
    %12 = tpu.dynamic_rotate %1 by %c497_i32 dim 1 : vector<8x512xf32>, i32 -> vector<8x512xf32>
    %c496_i32 = arith.constant 496 : i32
    %13 = tpu.dynamic_rotate %1 by %c496_i32 dim 1 : vector<8x512xf32>, i32 -> vector<8x512xf32>
    %c495_i32 = arith.constant 495 : i32
    %14 = tpu.dynamic_rotate %1 by %c495_i32 dim 1 : vector<8x512xf32>, i32 -> vector<8x512xf32>
    %15 = tpu.concatenate %7, %8, %9, %10, %1, %11, %12, %13, %14 in 0 : vector<8x512xf32>, vector<8x512xf32>, vector<8x512xf32>, vector<8x512xf32>, vector<8x512xf32>, vector<8x512xf32>, vector<8x512xf32>, vector<8x512xf32>, vector<8x512xf32> -> vector<72x512xf32>
    %16 = arith.mulf %15, %2 : vector<72x512xf32>
    %cst = arith.constant dense<0.000000e+00> : vector<8x512xf32>
    %17 = tpu.matmul %3, %16, %cst {dimension_numbers = #tpu.dot_dimension_numbers<[1], [0], [0], [1], [0, 0, 1, 1], [], []>} : vector<8x72xf32>, vector<72x512xf32>, vector<8x512xf32> -> vector<8x512xf32>
    %18 = vector.broadcast %5 : vector<8x1xf32> to vector<8x512xf32>
    %19 = arith.addf %17, %18 : vector<8x512xf32>
    %cst_12 = arith.constant 0.000000e+00 : f32
    %20 = vector.broadcast %cst_12 : f32 to vector<8x512xf32>
    %21 = arith.maximumf %19, %20 : vector<8x512xf32>
    %c17_i32_13 = arith.constant 17 : i32
    %22 = tpu.dynamic_rotate %21 by %c17_i32_13 dim 1 : vector<8x512xf32>, i32 -> vector<8x512xf32>
    %c16_i32_14 = arith.constant 16 : i32
    %23 = tpu.dynamic_rotate %21 by %c16_i32_14 dim 1 : vector<8x512xf32>, i32 -> vector<8x512xf32>
    %c15_i32_15 = arith.constant 15 : i32
    %24 = tpu.dynamic_rotate %21 by %c15_i32_15 dim 1 : vector<8x512xf32>, i32 -> vector<8x512xf32>
    %c1_i32_16 = arith.constant 1 : i32
    %25 = tpu.dynamic_rotate %21 by %c1_i32_16 dim 1 : vector<8x512xf32>, i32 -> vector<8x512xf32>
    %c511_i32_17 = arith.constant 511 : i32
    %26 = tpu.dynamic_rotate %21 by %c511_i32_17 dim 1 : vector<8x512xf32>, i32 -> vector<8x512xf32>
    %c497_i32_18 = arith.constant 497 : i32
    %27 = tpu.dynamic_rotate %21 by %c497_i32_18 dim 1 : vector<8x512xf32>, i32 -> vector<8x512xf32>
    %c496_i32_19 = arith.constant 496 : i32
    %28 = tpu.dynamic_rotate %21 by %c496_i32_19 dim 1 : vector<8x512xf32>, i32 -> vector<8x512xf32>
    %c495_i32_20 = arith.constant 495 : i32
    %29 = tpu.dynamic_rotate %21 by %c495_i32_20 dim 1 : vector<8x512xf32>, i32 -> vector<8x512xf32>
    %30 = tpu.concatenate %22, %23, %24, %25, %21, %26, %27, %28, %29 in 0 : vector<8x512xf32>, vector<8x512xf32>, vector<8x512xf32>, vector<8x512xf32>, vector<8x512xf32>, vector<8x512xf32>, vector<8x512xf32>, vector<8x512xf32>, vector<8x512xf32> -> vector<72x512xf32>
    %31 = arith.mulf %30, %2 : vector<72x512xf32>
    %cst_21 = arith.constant dense<0.000000e+00> : vector<8x512xf32>
    %32 = tpu.matmul %4, %31, %cst_21 {dimension_numbers = #tpu.dot_dimension_numbers<[1], [0], [0], [1], [0, 0, 1, 1], [], []>} : vector<8x72xf32>, vector<72x512xf32>, vector<8x512xf32> -> vector<8x512xf32>
    %33 = vector.broadcast %6 : vector<8x1xf32> to vector<8x512xf32>
    %34 = arith.addf %32, %33 : vector<8x512xf32>
    %35 = arith.addf %34, %1 : vector<8x512xf32>
    %cst_22 = arith.constant 0.000000e+00 : f32
    %36 = vector.broadcast %cst_22 : f32 to vector<8x512xf32>
    %37 = arith.maximumf %35, %36 : vector<8x512xf32>
    %c0_23 = arith.constant 0 : index
    %c0_24 = arith.constant 0 : index
    %c0_25 = arith.constant 0 : index
    %38 = vector.load %arg7[%c0_23, %c0_24, %c0_25] : memref<1x8x512xf32, #tpu.memory_space<vmem>>, vector<1x8x512xf32>
    %39 = vector.shape_cast %38 : vector<1x8x512xf32> to vector<8x512xf32>
    %40 = vector.shape_cast %37 : vector<8x512xf32> to vector<1x8x512xf32>
    tpu.vector_store %arg7[%c0_23, %c0_24, %c0_25], %40 {strides = array<i32>} : memref<1x8x512xf32, #tpu.memory_space<vmem>>, vector<1x8x512xf32>,
    return
  }
  func.func @transform_0(%arg0: i32) -> (i32, i32, i32) {
    %c0_i32 = arith.constant 0 : i32
    %c0_i32_0 = arith.constant 0 : i32
    %c0_i32_1 = arith.constant 0 : i32
    return %arg0, %c0_i32, %c0_i32_0 : i32, i32, i32
  }
  func.func @transform_1(%arg0: i32) -> (i32, i32) {
    %c0_i32 = arith.constant 0 : i32
    %c0_i32_0 = arith.constant 0 : i32
    %c0_i32_1 = arith.constant 0 : i32
    return %c0_i32, %c0_i32_0 : i32, i32
  }
  func.func @transform_2(%arg0: i32) -> (i32, i32) {
    %c0_i32 = arith.constant 0 : i32
    %c0_i32_0 = arith.constant 0 : i32
    %c0_i32_1 = arith.constant 0 : i32
    return %c0_i32, %c0_i32_0 : i32, i32
  }
  func.func @transform_3(%arg0: i32) -> (i32, i32) {
    %c0_i32 = arith.constant 0 : i32
    %c0_i32_0 = arith.constant 0 : i32
    %c0_i32_1 = arith.constant 0 : i32
    return %c0_i32, %c0_i32_0 : i32, i32
  }
  func.func @transform_4(%arg0: i32) -> (i32, i32) {
    %c0_i32 = arith.constant 0 : i32
    %c0_i32_0 = arith.constant 0 : i32
    %c0_i32_1 = arith.constant 0 : i32
    return %c0_i32, %c0_i32_0 : i32, i32
  }
  func.func @transform_5(%arg0: i32) -> (i32, i32) {
    %c0_i32 = arith.constant 0 : i32
    %c0_i32_0 = arith.constant 0 : i32
    %c0_i32_1 = arith.constant 0 : i32
    return %c0_i32, %c0_i32_0 : i32, i32
  }
  func.func @transform_6(%arg0: i32) -> (i32, i32, i32) {
    %c0_i32 = arith.constant 0 : i32
    %c0_i32_0 = arith.constant 0 : i32
    %c0_i32_1 = arith.constant 0 : i32
    return %arg0, %c0_i32, %c0_i32_0 : i32, i32, i32
  }
}

</mosaic_0001>

<bundles_post_ra>
// kernel: tpu_custom_call.1
= control target key start
LH: loop header
LB: loop body
LE: loop exit
PB: predicated region body
PF: predicated region fallthrough
CT: control target
= control target key end

     0   :  { %11 = vsyncpa [#allocation3], 0  ;;  %s1230_s0 = inlined_call_operand.hbm [shape: f32[1,8,512], index: 0, kind: input, shape index: {}]   ;;  %s1231_s1 = inlined_call_operand.hbm [shape: f32[72,512], index: 1, kind: input, shape index: {}]   ;;  %s1232_s2 = inlined_call_operand.vmem [shape: f32[8,72], index: 2, kind: input, shape index: {}]   ;;  %s1233_s3 = inlined_call_operand.vmem [shape: f32[8,1], index: 3, kind: input, shape index: {}]   ;;  %s1234_s4 = inlined_call_operand.vmem [shape: f32[8,72], index: 4, kind: input, shape index: {}]   ;;  %s1235_s5 = inlined_call_operand.vmem [shape: f32[8,1], index: 5, kind: input, shape index: {}]   ;;  %s1236_s6 = inlined_call_operand.hbm [shape: f32[1,8,512], index: 6, kind: output, shape index: {}]  }
   0x1   :  { %12 = vsyncpa [#allocation6], 0 }
   0x2   :  { %13 = vsyncpa [#allocation4], 0  ;;  %s19_s23 = sshll.u32 %s1230_s0, 4  ;;  %s685_s24 = smov [#allocation2]   ;;  %s20_s23 = int_to_ptr.hbm [resolvable:$true] %s19_s23 }
   0x3   :  { %s21_s25 = sshll.u32 %s685_s24, 4  ;;  %s29_s28 = sshll.u32 %s1231_s1, 4  ;;  %s22_s25 = int_to_ptr.vmem [resolvable:$true] %s21_s25  ;;  %s30_s28 = int_to_ptr.hbm [resolvable:$true] %s29_s28 }
   0x4   :  { %24 = dma.hbm_to_vmem [thread:$0]  %s20_s23, 512, %s22_s25, [#allocation3]  }
   0x5   :  { %s686_s29 = smov [#allocation5]   ;;  %s687_s7 = smov 512  }
   0x6   :  { %s31_s30 = sshll.u32 %s686_s29, 4  ;;  %s688_s8 = smov 32   ;;  %s32_s30 = int_to_ptr.vmem [resolvable:$true] %s31_s30 }
   0x7   :  { %37 = dma.hbm_to_vmem [thread:$0]  %s30_s28, 4608, %s32_s30, [#allocation6], %s687_s7, %s687_s7, %s688_s8  }
   0x8   :  { %679 = dma.done.wait [#allocation3], 512  }
   0x9   :  { %680 = vsyncadd [#allocation3], 4294966784 }
   0xa   :  { %681 = dma.done.wait [#allocation6], 4608  }
   0xb   :  { %682 = vsyncadd [#allocation6], 4294962688  ;;  %v740_v0 = vld [vmem:[#allocation2 + $0x18] sm:$0xff]  ;;  %v742_v1 = vld [vmem:[#allocation2 + $0x10] sm:$0xff]  ;;  %s689_s0 = smov 111   ;;  %s690_s1 = smov 112   ;;  %v106_v6 = vlaneseq }
   0xc   :  { %v744_v2 = vld [vmem:[#allocation2] sm:$0xff]  ;;  %197 = vrot.lane.b32.xlu1 %v740_v0, %s689_s0  ;;  %182 = vrot.lane.b32.xlu2 %v742_v1, %s690_s1  ;;  %s691_s9 = smov 113   ;;  %s692_s10 = smov 127   ;;  %v770_v3 = vld [vmem:[#allocation2 + $0x8] sm:$0xff]  ;;  %v817_v10 = vld [vmem:[#allocation5 + $0x118] sm:$0xff]  ;;  %vm245_vm8 = vcmask 588800  }
   0xd   :  { %191 = vrot.lane.b32.xlu0 %v744_v2, %s689_s0  ;;  %1238 = vst [vmem:[#allocation11_spill] sm:$0xff] %v770_v3  ;;  %s693_s11 = smov 1   ;;  %s694_s12 = smov 15   ;;  %v814_v7 = vand.u32 127, %v106_v6  ;;  %v823_v14 = vld [vmem:[#allocation5 + $0xf8] sm:$0xff]  ;;  %v825_v16 = vld [vmem:[#allocation5 + $0x110] sm:$0xff] }
   0xe   :  { %s695_s13 = smov 16   ;;  %s696_s14 = smov 17   ;;  %v834_v22 = vld [vmem:[#allocation5 + $0xf0] sm:$0xff]  ;;  %v842_v28 = vld [vmem:[#allocation5 + $0xd8] sm:$0xff]  ;;  %v877_v49 = vld [vmem:[#allocation5 + $0x100] sm:$0xff] }
   0xf   :  { %vm199_vm0 = vcmp.lt.s32.totalorder %v814_v7, 111  ;;  %vm186_vm1 = vcmp.lt.s32.totalorder %v814_v7, 112  ;;  %vm173_vm2 = vcmp.lt.s32.totalorder %v814_v7, 113  ;;  %v840_v26 = vld [vmem:[#allocation5 + $0xd0] sm:$0xff]  ;;  %vm160_vm3 = vcmp.lt.s32.totalorder %v814_v7, 127  ;;  %v859_v38 = vld [vmem:[#allocation5 + $0xb8] sm:$0xff] }
  0x10   :  { %v853_v35 = vld [vmem:[#allocation5 + $0xb0] sm:$0xff]  ;;  %v861_v39 = vld [vmem:[#allocation5 + $0x98] sm:$0xff]  ;;  %v879_v50 = vld [vmem:[#allocation5 + $0x108] sm:$0xff]  ;;  %vm147_vm4 = vcmp.lt.s32.totalorder %v814_v7, 1  ;;  %vm134_vm5 = vcmp.lt.s32.totalorder %v814_v7, 15  ;;  %vm121_vm6 = vcmp.lt.s32.totalorder %v814_v7, 16 }
  0x11   :  { %v855_v36 = vld [vmem:[#allocation5 + $0x90] sm:$0xff]  ;;  %v223_v46 = vmul.f32 %v861_v39, %v740_v0  ;;  %v890_v56 = vld [vmem:[#allocation5 + $0xe0] sm:$0xff]  ;;  %v892_v57 = vld [vmem:[#allocation5 + $0xe8] sm:$0xff]  ;;  %vm108_vm7 = vcmp.lt.s32.totalorder %v814_v7, 17  ;;  %s572_s23 = sshll.u32 %s1236_s6, 4  ;;  %s573_s23 = int_to_ptr.hbm [resolvable:$true] %s572_s23 }
  0x12   :  { %v222_v44 = vmul.f32 %v855_v36, %v742_v1  ;;  %v900_v62 = vld [vmem:[#allocation5 + $0xc0] sm:$0xff]  ;;  %v902_v63 = vld [vmem:[#allocation5 + $0xc8] sm:$0xff] }
  0x14   :  { %184 = vrot.lane.b32.xlu2 %v740_v0, %s690_s1  ;;  %178 = vrot.lane.b32.xlu1 %v744_v2, %s690_s1 }
  0x15   :  { %195 = vrot.lane.b32.xlu0 %v742_v1, %s689_s0 }
  0x1c   :  { %171 = vrot.lane.b32.xlu2 %v740_v0, %s691_s9  ;;  %169 = vrot.lane.b32.xlu1 %v742_v1, %s691_s9 }
  0x1d   :  { %165 = vrot.lane.b32.xlu0 %v744_v2, %s691_s9 }
  0x24   :  { %158 = vrot.lane.b32.xlu2 %v740_v0, %s692_s10  ;;  %156 = vrot.lane.b32.xlu1 %v742_v1, %s692_s10 }
  0x25   :  { %152 = vrot.lane.b32.xlu0 %v744_v2, %s692_s10 }
  0x2c   :  { %141 = vrot.lane.b32.xlu2 %v770_v3, %s693_s11  ;;  %180 = vrot.lane.b32.xlu1 %v770_v3, %s690_s1 }
  0x2d   :  { %193 = vrot.lane.b32.xlu0 %v770_v3, %s689_s0 }
  0x34   :  { %167 = vrot.lane.b32.xlu2 %v770_v3, %s691_s9  ;;  %145 = vrot.lane.b32.xlu1 %v740_v0, %s693_s11 }
  0x35   :  { %143 = vrot.lane.b32.xlu0 %v742_v1, %s693_s11 }
  0x3c   :  { %132 = vrot.lane.b32.xlu2 %v740_v0, %s694_s12  ;;  %130 = vrot.lane.b32.xlu1 %v742_v1, %s694_s12 }
  0x3d   :  { %128 = vrot.lane.b32.xlu0 %v770_v3, %s694_s12 }
  0x44   :  { %117 = vrot.lane.b32.xlu2 %v742_v1, %s695_s13  ;;  %115 = vrot.lane.b32.xlu1 %v770_v3, %s695_s13 }
  0x45   :  { %154 = vrot.lane.b32.xlu0 %v770_v3, %s692_s10 }
  0x4c   :  { %102 = vrot.lane.b32.xlu2 %v742_v1, %s696_s14  ;;  %100 = vrot.lane.b32.xlu1 %v770_v3, %s696_s14 }
  0x4d   :  { %119 = vrot.lane.b32.xlu0 %v740_v0, %s695_s13 }
  0x54   :  { %126 = vrot.lane.b32.xlu2 %v744_v2, %s694_s12  ;;  %139 = vrot.lane.b32.xlu1 %v744_v2, %s693_s11 }
  0x55   :  { %104 = vrot.lane.b32.xlu0 %v740_v0, %s696_s14 }
  0x5c   :  { %98 = vrot.lane.b32.xlu1 %v744_v2, %s696_s14 }
  0x5d   :  { %113 = vrot.lane.b32.xlu0 %v744_v2, %s695_s13 }
  0x66   :  { %v812_v4 = vpop.permute.xlu2 %182 }
  0x6e   :  { %v185_v5 = vpop.permute.xlu2 %184 }
  0x6f   :  { %v187_v19 = vsel %vm186_vm1, %v812_v4, %v185_v5 }
  0x70   :  { %v234_v25 = vmul.f32 %v187_v19, %v834_v22 }
  0x76   :  { %v172_v8 = vpop.permute.xlu2 %171 }
  0x7e   :  { %v198_v9 = vpop.permute.xlu1 %197  ;;  %v159_v20 = vpop.permute.xlu2 %158 }
  0x7f   :  { %v192_v11 = vpop.permute.xlu0 %191 }
  0x80   :  { %v203_v12 = vsel %vm199_vm0, %v198_v9, %v192_v11 }
  0x81   :  { %v239_v13 = vmul.f32 %v203_v12, %v817_v10  ;;  %v913_v12 = vld [vmem:[#allocation5 + $0x70] sm:$0xff] }
  0x83   :  { %316 = vmatpush.msra.mxu3 %v239_v13  ;;  %v915_v13 = vld [vmem:[#allocation5 + $0x78] sm:$0xff] }
  0x86   :  { %v179_v15 = vpop.permute.xlu1 %178  ;;  %v850_v34 = vpop.permute.xlu2 %141 }
  0x87   :  { %v190_v17 = vsel %vm186_vm1, %v185_v5, %v179_v15  ;;  %v196_v18 = vpop.permute.xlu0 %195 }
  0x88   :  { %v200_v21 = vsel %vm199_vm0, %v196_v18, %v198_v9  ;;  %v235_v23 = vmul.f32 %v190_v17, %v823_v14 }
  0x89   :  { %v238_v24 = vmul.f32 %v200_v21, %v825_v16  ;;  %v926_v21 = vld [vmem:[#allocation5 + $0x58] sm:$0xff] }
  0x8a   :  { %317 = vmatpush.msra.mxu3 %v235_v23 }
  0x8b   :  { %296 = vmatpush.msra.mxu2 %v238_v24  ;;  %v928_v24 = vld [vmem:[#allocation5 + $0x50] sm:$0xff] }
  0x8d   :  { %297 = vmatpush.msra.mxu2 %v234_v25 }
  0x8e   :  { %v170_v27 = vpop.permute.xlu1 %169  ;;  %v168_v47 = vpop.permute.xlu2 %167 }
  0x8f   :  { %v174_v29 = vsel %vm173_vm2, %v170_v27, %v172_v8  ;;  %v166_v30 = vpop.permute.xlu0 %165  ;;  %v175_v60 = vsel %vm173_vm2, %v168_v47, %v170_v27 }
  0x90   :  { %v177_v31 = vsel %vm173_vm2, %v172_v8, %v166_v30  ;;  %v230_v32 = vmul.f32 %v174_v29, %v840_v26  ;;  %v176_v61 = vsel %vm173_vm2, %v166_v30, %v168_v47  ;;  %v229_v8 = vmul.f32 %v175_v60, %v902_v63 }
  0x91   :  { %v231_v33 = vmul.f32 %v177_v31, %v842_v28  ;;  %v228_v6 = vmul.f32 %v176_v61, %v900_v62 }
  0x92   :  { %298 = vmatpush.msra.mxu2 %v230_v32 }
  0x93   :  { %318 = vmatpush.msra.mxu3 %v231_v33  ;;  %v938_v33 = vld [vmem:[#allocation5 + $0xa0] sm:$0xff] }
  0x96   :  { %v857_v37 = vpop.permute.xlu1 %156  ;;  %v909_v9 = vpop.permute.xlu2 %132 }
  0x97   :  { %v161_v40 = vsel %vm160_vm3, %v857_v37, %v159_v20  ;;  %v866_v41 = vpop.permute.xlu0 %152 }
  0x98   :  { %v164_v42 = vsel %vm160_vm3, %v159_v20, %v866_v41  ;;  %v226_v43 = vmul.f32 %v161_v40, %v853_v35  ;;  %v940_v40 = vld [vmem:[#allocation5 + $0xa8] sm:$0xff] }
  0x99   :  { %v227_v45 = vmul.f32 %v164_v42, %v859_v38  ;;  %v942_v42 = vld [vmem:[#allocation5 + $0x30] sm:$0xff] }
  0x9a   :  { %299 = vmatpush.msra.mxu2 %v226_v43 }
  0x9b   :  { %319 = vmatpush.msra.mxu3 %v227_v45  ;;  %v948_v45 = vld [vmem:[#allocation5 + $0x88] sm:$0xff] }
  0x9c   :  { %300 = vmatpush.msra.mxu2 %v222_v44  ;;  %v946_v44 = vld [vmem:[#allocation5 + $0x80] sm:$0xff]  ;;  %v221_v60 = vmul.f32 %v948_v45, %v770_v3 }
  0x9d   :  { %320 = vmatpush.msra.mxu3 %v223_v46  ;;  %v96_v46 = vld [vmem:[%s1233_s3] sm:$0xff] }
  0x9e   :  { %v181_v48 = vpop.permute.xlu1 %180  ;;  %v118_v29 = vpop.permute.xlu2 %117 }
  0x9f   :  { %v194_v51 = vpop.permute.xlu0 %193  ;;  %v188_v52 = vsel %vm186_vm1, %v181_v48, %v812_v4  ;;  %v189_v53 = vsel %vm186_vm1, %v179_v15, %v181_v48 }
  0xa0   :  { %v202_v54 = vsel %vm199_vm0, %v192_v11, %v194_v51  ;;  %v201_v55 = vsel %vm199_vm0, %v194_v51, %v196_v18  ;;  %v232_v4 = vmul.f32 %v189_v53, %v890_v56  ;;  %v233_v5 = vmul.f32 %v188_v52, %v892_v57 }
  0xa1   :  { %v236_v58 = vmul.f32 %v202_v54, %v877_v49  ;;  %v237_v59 = vmul.f32 %v201_v55, %v879_v50  ;;  %v697_v51 = vmov 0  }
  0xa2   :  { %605 = vset.pattern.permute.xlu2 %v697_v51  ;;  %606 = vset.pattern.permute.xlu0 %v697_v51  ;;  %v1003_v51 = vld [vmem:[#allocation5 + $0x48] sm:$0xff] }
  0xa3   :  { %256 = vmatpush.msra.mxu0 %v236_v58  ;;  %276 = vmatpush.msra.mxu1 %v237_v59  ;;  %v220_v59 = vmul.f32 %v946_v44, %v744_v2 }
  0xa4   :  { %242 = vperm.xlu2 %605, %v96_v46  }
  0xa5   :  { %257 = vmatpush.msra.mxu0 %v232_v4  ;;  %277 = vmatpush.msra.mxu1 %v233_v5  ;;  %v972_v4 = vld [vmem:[#allocation5 + $0x38] sm:$0xff] }
  0xa6   :  { %v911_v11 = vpop.permute.xlu1 %145  ;;  %v103_v61 = vpop.permute.xlu2 %102 }
  0xa7   :  { %258 = vmatpush.msra.mxu0 %v228_v6  ;;  %278 = vmatpush.msra.mxu1 %v229_v8  ;;  %v144_v15 = vpop.permute.xlu0 %143 }
  0xa8   :  { %v148_v17 = vsel %vm147_vm4, %v144_v15, %v911_v11  ;;  %v149_v18 = vsel %vm147_vm4, %v850_v34, %v144_v15 }
  0xa9   :  { %v218_v19 = vmul.f32 %v149_v18, %v913_v12  ;;  %v219_v20 = vmul.f32 %v148_v17, %v915_v13  ;;  %v94_v17 = vld [vmem:[%s1232_s2] sm:$0xff] }
  0xab   :  { %301 = vmatpush.msra.mxu2 %v218_v19  ;;  %321 = vmatpush.msra.mxu3 %v219_v20  ;;  %v984_v20 = vld [vmem:[#allocation5 + $0x60] sm:$0xff] }
  0xae   :  { %v131_v23 = vpop.permute.xlu1 %130  ;;  %v127_v19 = vpop.permute.xlu2 %126 }
  0xaf   :  { %v135_v25 = vsel %vm134_vm5, %v131_v23, %v909_v9  ;;  %v129_v27 = vpop.permute.xlu0 %128 }
  0xb0   :  { %v136_v30 = vsel %vm134_vm5, %v129_v27, %v131_v23  ;;  %v215_v31 = vmul.f32 %v135_v25, %v926_v21  ;;  %v986_v23 = vld [vmem:[#allocation5 + $0x68] sm:$0xff] }
  0xb1   :  { %v214_v32 = vmul.f32 %v136_v30, %v928_v24  ;;  %v138_v30 = vsel %vm134_vm5, %v909_v9, %v127_v19 }
  0xb2   :  { %322 = vmatpush.msra.mxu3 %v215_v31  ;;  %v137_v31 = vsel %vm134_vm5, %v127_v19, %v129_v27 }
  0xb3   :  { %302 = vmatpush.msra.mxu2 %v214_v32 }
  0xb6   :  { %v944_v43 = vpop.permute.xlu1 %115 }
  0xb7   :  { %v123_v47 = vsel %vm121_vm6, %v944_v43, %v118_v29  ;;  %v155_v48 = vpop.permute.xlu0 %154 }
  0xb8   :  { %v162_v52 = vsel %vm160_vm3, %v155_v48, %v857_v37  ;;  %v163_v53 = vsel %vm160_vm3, %v866_v41, %v155_v48  ;;  %v210_v54 = vmul.f32 %v123_v47, %v942_v42  ;;  %v970_v37 = vld [vmem:[#allocation5 + $0x10] sm:$0xff]  ;;  %v1001_v48 = vld [vmem:[#allocation5 + $0x40] sm:$0xff] }
  0xb9   :  { %v224_v55 = vmul.f32 %v163_v53, %v938_v33  ;;  %v225_v58 = vmul.f32 %v162_v52, %v940_v40 }
  0xba   :  { %303 = vmatpush.msra.mxu2 %v210_v54 }
  0xbb   :  { %259 = vmatpush.msra.mxu0 %v224_v55  ;;  %279 = vmatpush.msra.mxu1 %v225_v58  ;;  %v1013_v55 = vld [vmem:[#allocation5 + $0x20] sm:$0xff]  ;;  %v1015_v58 = vld [vmem:[#allocation5 + $0x28] sm:$0xff] }
  0xbd   :  { %260 = vmatpush.msra.mxu0 %v220_v59  ;;  %280 = vmatpush.msra.mxu1 %v221_v60 }
  0xbe   :  { %v101_v41 = vpop.permute.xlu1 %100 }
  0xbf   :  { %v110_v5 = vsel %vm108_vm7, %v101_v41, %v103_v61  ;;  %v120_v6 = vpop.permute.xlu0 %119 }
  0xc0   :  { %v122_v8 = vsel %vm121_vm6, %v118_v29, %v120_v6  ;;  %v206_v15 = vmul.f32 %v110_v5, %v970_v37  ;;  %v988_v29 = vld [vmem:[#allocation5 + $0x18] sm:$0xff] }
  0xc1   :  { %v211_v18 = vmul.f32 %v122_v8, %v972_v4 }
  0xc2   :  { %304 = vmatpush.msra.mxu2 %v206_v15  ;;  %v1026_v15 = vld [vmem:[#allocation5] sm:$0xff] }
  0xc3   :  { %323 = vmatpush.msra.mxu3 %v211_v18  ;;  %585 = vmatmul.msk.f32.vlgmr.msra.gmra.mxu2 %vm245_vm8, %v94_v17  ;;  %v1028_v18 = vld [vmem:[#allocation5 + $0x8] sm:$0xff] }
  0xc6   :  { %v140_v25 = vpop.permute.xlu1 %139 }
  0xc7   :  { %v150_v32 = vsel %vm147_vm4, %v140_v25, %v850_v34  ;;  %v151_v46 = vsel %vm147_vm4, %v911_v11, %v140_v25  ;;  %v105_v47 = vpop.permute.xlu0 %104  ;;  %v212_v34 = vmul.f32 %v138_v30, %v1001_v48  ;;  %v213_v11 = vmul.f32 %v137_v31, %v1003_v51 }
  0xc8   :  { %v109_v52 = vsel %vm108_vm7, %v103_v61, %v105_v47  ;;  %v216_v9 = vmul.f32 %v151_v46, %v984_v20  ;;  %v217_v27 = vmul.f32 %v150_v32, %v986_v23 }
  0xc9   :  { %v207_v53 = vmul.f32 %v109_v52, %v988_v29 }
  0xca   :  { %261 = vmatpush.msra.mxu0 %v216_v9  ;;  %281 = vmatpush.msra.mxu1 %v217_v27 }
  0xcb   :  { %324 = vmatpush.msra.mxu3 %v207_v53 }
  0xcc   :  { %262 = vmatpush.msra.mxu0 %v212_v34  ;;  %282 = vmatpush.msra.mxu1 %v213_v11 }
  0xcd   :  { %586 = vmatmul.msk.f32.vlgmr.msra.gmra.mxu3 %vm245_vm8, %v94_v17 }
  0xce   :  { %v99_v54 = vpop.permute.xlu1 %98 }
  0xcf   :  { %v114_v59 = vpop.permute.xlu0 %113  ;;  %v111_v60 = vsel %vm108_vm7, %v99_v54, %v101_v41  ;;  %v112_v61 = vsel %vm108_vm7, %v105_v47, %v99_v54  ;;  %v97_v54 = vld [vmem:[%s1235_s5] sm:$0xff] }
  0xd0   :  { %v124_v5 = vsel %vm121_vm6, %v114_v59, %v944_v43  ;;  %v125_v8 = vsel %vm121_vm6, %v120_v6, %v114_v59  ;;  %v204_v41 = vmul.f32 %v112_v61, %v1026_v15  ;;  %v205_v30 = vmul.f32 %v111_v60, %v1028_v18 }
  0xd1   :  { %v208_v19 = vmul.f32 %v125_v8, %v1013_v55  ;;  %v209_v25 = vmul.f32 %v124_v5, %v1015_v58 }
  0xd3   :  { %263 = vmatpush.msra.mxu0 %v208_v19  ;;  %283 = vmatpush.msra.mxu1 %v209_v25 }
  0xd5   :  { %264 = vmatpush.msra.mxu0 %v204_v41  ;;  %284 = vmatpush.msra.mxu1 %v205_v30 }
  0xd6   :  { %583 = vmatmul.msk.f32.vlgmr.msra.gmra.mxu0 %vm245_vm8, %v94_v17  ;;  %584 = vmatmul.msk.f32.vlgmr.msra.gmra.mxu1 %vm245_vm8, %v94_v17 }
  0xfe   :  { %v243_v43 = vpop.permute.xlu2 %242 }
 0x146   :  { %v306_v53 = vpop.f32.mrf.mxu2 }
 0x147   :  { %v307_v34 = vadd.f32 %v306_v53, %v243_v43 }
 0x149   :  { %v1057_v11 = vmax.f32 %v307_v34, 0.0 }
 0x150   :  { %v326_v9 = vpop.f32.mrf.mxu3 }
 0x151   :  { %v327_v17 = vadd.f32 %v326_v9, %v243_v43 }
 0x153   :  { %v266_v6 = vpop.f32.mrf.mxu0  ;;  %v286_v31 = vpop.f32.mrf.mxu1  ;;  %v332_v27 = vmax.f32 %v327_v17, 0.0 }
 0x154   :  { %v267_v32 = vadd.f32 %v266_v6, %v243_v43  ;;  %v287_v46 = vadd.f32 %v286_v31, %v243_v43 }
 0x156   :  { %v1036_v47 = vmax.f32 %v267_v32, 0.0  ;;  %v1038_v52 = vmax.f32 %v287_v46, 0.0 }
 0x158   :  { %371 = vrot.lane.b32.xlu2 %v1038_v52, %s693_s11  ;;  %407 = vrot.lane.b32.xlu1 %v1038_v52, %s690_s1 }
 0x159   :  { %417 = vrot.lane.b32.xlu0 %v1036_v47, %s689_s0 }
 0x160   :  { %395 = vrot.lane.b32.xlu2 %v1038_v52, %s691_s9  ;;  %347 = vrot.lane.b32.xlu1 %v1038_v52, %s695_s13 }
 0x161   :  { %405 = vrot.lane.b32.xlu0 %v1036_v47, %s690_s1 }
 0x168   :  { %423 = vrot.lane.b32.xlu2 %v332_v27, %s689_s0  ;;  %335 = vrot.lane.b32.xlu1 %v1038_v52, %s696_s14 }
 0x169   :  { %393 = vrot.lane.b32.xlu0 %v1036_v47, %s691_s9 }
 0x170   :  { %411 = vrot.lane.b32.xlu2 %v332_v27, %s690_s1  ;;  %421 = vrot.lane.b32.xlu1 %v1057_v11, %s689_s0 }
 0x171   :  { %381 = vrot.lane.b32.xlu0 %v1036_v47, %s692_s10 }
 0x178   :  { %399 = vrot.lane.b32.xlu2 %v332_v27, %s691_s9  ;;  %409 = vrot.lane.b32.xlu1 %v1057_v11, %s690_s1 }
 0x179   :  { %419 = vrot.lane.b32.xlu0 %v1038_v52, %s689_s0 }
 0x180   :  { %387 = vrot.lane.b32.xlu2 %v332_v27, %s692_s10  ;;  %397 = vrot.lane.b32.xlu1 %v1057_v11, %s691_s9 }
 0x181   :  { %359 = vrot.lane.b32.xlu0 %v1038_v52, %s694_s12 }
 0x188   :  { %363 = vrot.lane.b32.xlu2 %v332_v27, %s694_s12  ;;  %385 = vrot.lane.b32.xlu1 %v1057_v11, %s692_s10 }
 0x189   :  { %383 = vrot.lane.b32.xlu0 %v1038_v52, %s692_s10 }
 0x190   :  { %349 = vrot.lane.b32.xlu2 %v1057_v11, %s695_s13  ;;  %375 = vrot.lane.b32.xlu1 %v332_v27, %s693_s11 }
 0x191   :  { %373 = vrot.lane.b32.xlu0 %v1057_v11, %s693_s11 }
 0x198   :  { %337 = vrot.lane.b32.xlu2 %v1057_v11, %s696_s14  ;;  %361 = vrot.lane.b32.xlu1 %v1057_v11, %s694_s12 }
 0x199   :  { %351 = vrot.lane.b32.xlu0 %v332_v27, %s695_s13 }
 0x1a0   :  { %357 = vrot.lane.b32.xlu2 %v1036_v47, %s694_s12  ;;  %369 = vrot.lane.b32.xlu1 %v1036_v47, %s693_s11 }
 0x1a1   :  { %339 = vrot.lane.b32.xlu0 %v332_v27, %s696_s14 }
 0x1a8   :  { %467 = vperm.xlu2 %605, %v97_v54   ;;  %333 = vrot.lane.b32.xlu1 %v1036_v47, %s696_s14 }
 0x1a9   :  { %345 = vrot.lane.b32.xlu0 %v1036_v47, %s695_s13 }
 0x1b2   :  { %v1101_v59 = vpop.permute.xlu2 %371 }
 0x1ba   :  { %v396_v60 = vpop.permute.xlu2 %395 }
 0x1c2   :  { %v424_v61 = vpop.permute.xlu2 %423 }
 0x1ca   :  { %v408_v5 = vpop.permute.xlu1 %407  ;;  %v412_v41 = vpop.permute.xlu2 %411 }
 0x1cb   :  { %v418_v8 = vpop.permute.xlu0 %417 }
 0x1cc   :  { %v428_v19 = vsel %vm199_vm0, %v424_v61, %v418_v8 }
 0x1cd   :  { %v464_v25 = vmul.f32 %v428_v19, %v817_v10 }
 0x1cf   :  { %540 = vmatpush.msrb.mxu3 %v464_v25 }
 0x1d2   :  { %v1106_v30 = vpop.permute.xlu1 %347  ;;  %v400_v32 = vpop.permute.xlu2 %399 }
 0x1d3   :  { %v406_v43 = vpop.permute.xlu0 %405 }
 0x1d4   :  { %v416_v6 = vsel %vm186_vm1, %v412_v41, %v406_v43 }
 0x1d5   :  { %v460_v31 = vmul.f32 %v416_v6, %v823_v14 }
 0x1d7   :  { %541 = vmatpush.msrb.mxu3 %v460_v31  ;;  %v448_v31 = vmul.f32 %v332_v27, %v861_v39 }
 0x1da   :  { %v1111_v46 = vpop.permute.xlu1 %335  ;;  %v388_v34 = vpop.permute.xlu2 %387 }
 0x1db   :  { %v394_v9 = vpop.permute.xlu0 %393 }
 0x1dc   :  { %v404_v17 = vsel %vm173_vm2, %v400_v32, %v394_v9 }
 0x1dd   :  { %v456_v10 = vmul.f32 %v404_v17, %v842_v28  ;;  %v415_v17 = vsel %vm186_vm1, %v406_v43, %v408_v5  ;;  %v403_v43 = vsel %vm173_vm2, %v394_v9, %v396_v60 }
 0x1df   :  { %542 = vmatpush.msrb.mxu3 %v456_v10 }
 0x1e2   :  { %v422_v53 = vpop.permute.xlu1 %421 }
 0x1e3   :  { %v425_v54 = vsel %vm199_vm0, %v422_v53, %v424_v61  ;;  %v382_v19 = vpop.permute.xlu0 %381 }
 0x1e4   :  { %v392_v14 = vsel %vm160_vm3, %v388_v34, %v382_v19  ;;  %v463_v25 = vmul.f32 %v425_v54, %v825_v16 }
 0x1e5   :  { %v452_v6 = vmul.f32 %v392_v14, %v859_v38 }
 0x1e6   :  { %520 = vmatpush.msrb.mxu2 %v463_v25 }
 0x1e7   :  { %543 = vmatpush.msrb.mxu3 %v452_v6 }
 0x1e9   :  { %544 = vmatpush.msrb.mxu3 %v448_v31  ;;  %v447_v31 = vmul.f32 %v1057_v11, %v855_v36 }
 0x1ea   :  { %v410_v28 = vpop.permute.xlu1 %409 }
 0x1eb   :  { %v413_v61 = vsel %vm186_vm1, %v410_v28, %v412_v41  ;;  %v420_v10 = vpop.permute.xlu0 %419  ;;  %v414_v3 = vsel %vm186_vm1, %v408_v5, %v410_v28  ;;  %v457_v5 = vmul.f32 %v415_v17, %v890_v56  ;;  %v446_v28 = vmul.f32 %v1038_v52, %v948_v45 }
 0x1ec   :  { %v426_v16 = vsel %vm199_vm0, %v420_v10, %v422_v53  ;;  %v427_v38 = vsel %vm199_vm0, %v418_v8, %v420_v10  ;;  %v459_v39 = vmul.f32 %v413_v61, %v834_v22  ;;  %v458_v41 = vmul.f32 %v414_v3, %v892_v57  ;;  %v364_v53 = vpop.permute.xlu2 %363 }
 0x1ed   :  { %v461_v27 = vmul.f32 %v427_v38, %v877_v49  ;;  %v462_v54 = vmul.f32 %v426_v16, %v879_v50  ;;  %v453_v8 = vmul.f32 %v403_v43, %v900_v62 }
 0x1ee   :  { %521 = vmatpush.msrb.mxu2 %v459_v39 }
 0x1ef   :  { %480 = vmatpush.msrb.mxu0 %v461_v27  ;;  %500 = vmatpush.msrb.mxu1 %v462_v54 }
 0x1f1   :  { %481 = vmatpush.msrb.mxu0 %v457_v5  ;;  %501 = vmatpush.msrb.mxu1 %v458_v41 }
 0x1f2   :  { %v398_v22 = vpop.permute.xlu1 %397 }
 0x1f3   :  { %v401_v49 = vsel %vm173_vm2, %v398_v22, %v400_v32  ;;  %v402_v50 = vsel %vm173_vm2, %v396_v60, %v398_v22  ;;  %482 = vmatpush.msrb.mxu0 %v453_v8  ;;  %v360_v9 = vpop.permute.xlu0 %359 }
 0x1f4   :  { %v454_v14 = vmul.f32 %v402_v50, %v902_v63  ;;  %v455_v56 = vmul.f32 %v401_v49, %v840_v26  ;;  %v350_v25 = vpop.permute.xlu2 %349 }
 0x1f6   :  { %502 = vmatpush.msrb.mxu1 %v454_v14  ;;  %522 = vmatpush.msrb.mxu2 %v455_v56 }
 0x1fa   :  { %v386_v3 = vpop.permute.xlu1 %385 }
 0x1fb   :  { %v389_v57 = vsel %vm160_vm3, %v386_v3, %v388_v34  ;;  %v384_v62 = vpop.permute.xlu0 %383  ;;  %v445_v34 = vmul.f32 %v1036_v47, %v946_v44  ;;  %v354_v47 = vsel %vm121_vm6, %v1106_v30, %v350_v25 }
 0x1fc   :  { %v390_v32 = vsel %vm160_vm3, %v384_v62, %v386_v3  ;;  %v391_v60 = vsel %vm160_vm3, %v382_v19, %v384_v62  ;;  %v451_v6 = vmul.f32 %v389_v57, %v853_v35  ;;  %v338_v44 = vpop.permute.xlu2 %337  ;;  %v435_v38 = vmul.f32 %v354_v47, %v942_v42 }
 0x1fd   :  { %v449_v63 = vmul.f32 %v391_v60, %v938_v33  ;;  %v450_v26 = vmul.f32 %v390_v32, %v940_v40  ;;  %v342_v16 = vsel %vm108_vm7, %v1111_v46, %v338_v44 }
 0x1fe   :  { %523 = vmatpush.msrb.mxu2 %v451_v6  ;;  %v431_v54 = vmul.f32 %v342_v16, %v970_v37 }
 0x1ff   :  { %483 = vmatpush.msrb.mxu0 %v449_v63  ;;  %503 = vmatpush.msrb.mxu1 %v450_v26  ;;  %v1239_v26 = vld [vmem:[#allocation11_spill] sm:$0xff] }
 0x200   :  { %524 = vmatpush.msrb.mxu2 %v447_v31 }
 0x201   :  { %484 = vmatpush.msrb.mxu0 %v445_v34  ;;  %504 = vmatpush.msrb.mxu1 %v446_v28 }
 0x202   :  { %v376_v35 = vpop.permute.xlu1 %375 }
 0x203   :  { %v374_v19 = vpop.permute.xlu0 %373 }
 0x204   :  { %v377_v33 = vsel %vm147_vm4, %v374_v19, %v376_v35  ;;  %v378_v36 = vsel %vm147_vm4, %v1101_v59, %v374_v19  ;;  %v358_v27 = vpop.permute.xlu2 %357 }
 0x205   :  { %v443_v40 = vmul.f32 %v378_v36, %v913_v12  ;;  %v444_v11 = vmul.f32 %v377_v33, %v915_v13  ;;  %v368_v43 = vsel %vm134_vm5, %v364_v53, %v358_v27  ;;  %v367_v37 = vsel %vm134_vm5, %v358_v27, %v360_v9 }
 0x206   :  { %v438_v49 = vmul.f32 %v367_v37, %v1003_v51 }
 0x207   :  { %525 = vmatpush.msrb.mxu2 %v443_v40  ;;  %545 = vmatpush.msrb.mxu3 %v444_v11 }
 0x20a   :  { %v362_v45 = vpop.permute.xlu1 %361 }
 0x20b   :  { %v365_v52 = vsel %vm134_vm5, %v362_v45, %v364_v53  ;;  %v366_v17 = vsel %vm134_vm5, %v360_v9, %v362_v45  ;;  %v352_v61 = vpop.permute.xlu0 %351 }
 0x20c   :  { %v353_v12 = vsel %vm121_vm6, %v350_v25, %v352_v61  ;;  %v439_v13 = vmul.f32 %v366_v17, %v928_v24  ;;  %v440_v10 = vmul.f32 %v365_v52, %v926_v21  ;;  %v95_v24 = vld [vmem:[%s1234_s4] sm:$0xff]  ;;  %s698_s4 = smov [#allocation7]  }
 0x20d   :  { %v436_v39 = vmul.f32 %v353_v12, %v972_v4  ;;  %s570_s20 = sshll.u32 %s698_s4, 4  ;;  %s571_s20 = int_to_ptr.vmem [resolvable:$true] %s570_s20 }
 0x20e   :  { %526 = vmatpush.msrb.mxu2 %v439_v13  ;;  %546 = vmatpush.msrb.mxu3 %v440_v10 }
 0x210   :  { %527 = vmatpush.msrb.mxu2 %v435_v38  ;;  %547 = vmatpush.msrb.mxu3 %v436_v39 }
 0x212   :  { %v370_v21 = vpop.permute.xlu1 %369  ;;  %528 = vmatpush.msrb.mxu2 %v431_v54 }
 0x213   :  { %v379_v42 = vsel %vm147_vm4, %v370_v21, %v1101_v59  ;;  %v380_v4 = vsel %vm147_vm4, %v376_v35, %v370_v21  ;;  %v340_v5 = vpop.permute.xlu0 %339  ;;  %589 = vmatmul.msk.f32.vlgmr.msrb.gmra.mxu2 %vm245_vm8, %v95_v24  ;;  %v437_v59 = vmul.f32 %v368_v43, %v1001_v48 }
 0x214   :  { %v341_v41 = vsel %vm108_vm7, %v338_v44, %v340_v5  ;;  %v441_v8 = vmul.f32 %v380_v4, %v984_v20  ;;  %v442_v53 = vmul.f32 %v379_v42, %v986_v23 }
 0x215   :  { %v432_v22 = vmul.f32 %v341_v41, %v988_v29 }
 0x216   :  { %485 = vmatpush.msrb.mxu0 %v441_v8  ;;  %505 = vmatpush.msrb.mxu1 %v442_v53 }
 0x217   :  { %548 = vmatpush.msrb.mxu3 %v432_v22 }
 0x218   :  { %590 = vmatmul.msk.f32.vlgmr.msrb.gmra.mxu3 %vm245_vm8, %v95_v24  ;;  %486 = vmatpush.msrb.mxu0 %v437_v59 }
 0x219   :  { %506 = vmatpush.msrb.mxu1 %v438_v49 }
 0x21a   :  { %v334_v50 = vpop.permute.xlu1 %333 }
 0x21b   :  { %v346_v9 = vpop.permute.xlu0 %345  ;;  %v343_v20 = vsel %vm108_vm7, %v334_v50, %v1111_v46  ;;  %v344_v23 = vsel %vm108_vm7, %v340_v5, %v334_v50 }
 0x21c   :  { %v355_v29 = vsel %vm121_vm6, %v346_v9, %v1106_v30  ;;  %v356_v48 = vsel %vm121_vm6, %v352_v61, %v346_v9  ;;  %v429_v56 = vmul.f32 %v344_v23, %v1026_v15  ;;  %v430_v46 = vmul.f32 %v343_v20, %v1028_v18  ;;  %v468_v30 = vpop.permute.xlu2 %467 }
 0x21d   :  { %v433_v51 = vmul.f32 %v356_v48, %v1013_v55  ;;  %v434_v14 = vmul.f32 %v355_v29, %v1015_v58 }
 0x21f   :  { %487 = vmatpush.msrb.mxu0 %v433_v51  ;;  %507 = vmatpush.msrb.mxu1 %v434_v14 }
 0x221   :  { %488 = vmatpush.msrb.mxu0 %v429_v56  ;;  %508 = vmatpush.msrb.mxu1 %v430_v46 }
 0x222   :  { %587 = vmatmul.msk.f32.vlgmr.msrb.gmra.mxu0 %vm245_vm8, %v95_v24  ;;  %588 = vmatmul.msk.f32.vlgmr.msrb.gmra.mxu1 %vm245_vm8, %v95_v24 }
 0x296   :  { %v530_v3 = vpop.f32.mrf.mxu2 }
 0x297   :  { %v531_v7 = vadd.f32 %v530_v3, %v468_v30 }
 0x299   :  { %v555_v57 = vadd.f32 %v531_v7, %v742_v1 }
 0x29b   :  { %v559_v55 = vmax.f32 %v555_v57, 0.0  ;;  %v550_v62 = vpop.f32.mrf.mxu3 }
 0x29c   :  { %v551_v58 = vadd.f32 %v550_v62, %v468_v30 }
 0x29d   :  { %563 = vst [vmem:[#allocation7 + $0x10] sm:$0xff] %v559_v55 }
 0x29e   :  { %v556_v25 = vadd.f32 %v551_v58, %v740_v0 }
 0x29f   :  { %v490_v15 = vpop.f32.mrf.mxu0  ;;  %v510_v32 = vpop.f32.mrf.mxu1 }
 0x2a0   :  { %v560_v18 = vmax.f32 %v556_v25, 0.0  ;;  %v491_v60 = vadd.f32 %v490_v15, %v468_v30  ;;  %v511_v6 = vadd.f32 %v510_v32, %v468_v30 }
 0x2a2   :  { %564 = vst [vmem:[#allocation7 + $0x18] sm:$0xff] %v560_v18  ;;  %v553_v63 = vadd.f32 %v491_v60, %v744_v2  ;;  %v554_v31 = vadd.f32 %v511_v6, %v1239_v26 }
 0x2a4   :  { %v557_v1 = vmax.f32 %v553_v63, 0.0  ;;  %v558_v34 = vmax.f32 %v554_v31, 0.0 }
 0x2a6   :  { %561 = vst [vmem:[#allocation7] sm:$0xff] %v557_v1 }
 0x2a7   :  { %562 = vst [vmem:[#allocation7 + $0x8] sm:$0xff] %v558_v34 }
 0x2a8   :  { %575 = dma.vmem_to_hbm [thread:$0]  %s571_s20, 512, %s573_s23, [#allocation4]  }
 0x2a9   :  { %683 = dma.done.wait [#allocation4], 512  }
 0x2aa   :  { %684 = vsyncadd [#allocation4], 4294966784 }
 0x2ab   :  { %580 = vsyncpa [#allocation3], 1 }
 0x2ac   :  { %581 = vsyncpa [#allocation6], 1 }
 0x2ad   :  { %582 = vsyncpa [#allocation4], 1 }

</bundles_post_ra>
